<compile_context>
chip_gen: v7x
topology: tpu7x:2x2x1
jax: 0.10.0
libtpu: 0.0.40
codegen_flags: <defaults>
</compile_context>

<pallas_src>
import functools

import jax
import jax.numpy as jnp
from jax.experimental import pallas as pl
from jax.experimental.pallas import tpu as pltpu


# ----------------------------------------------------------------------------
# Kernel (unified NeoX / interleaved rotation on flattened (tn, H*D) blocks)
# ----------------------------------------------------------------------------
def _rope_kernel(q_ref, k_ref, cf_ref, sa_ref, sb_ref, q_out_ref, k_out_ref, *,
                 hq, hk, shift, compute_dtype):
    """out = x * cosF + roll(x, L-shift) * sinA + roll(x, +shift) * sinB.

    cf/sa/sb are per-position coefficient rows of width D; they are lane-tiled
    to H*D once per grid step (XLU work, free slack in a mem-bound kernel).
    Cross-head / wrap-around lanes of each roll always multiply a zero coefficient.
    """
    cf = cf_ref[...].astype(compute_dtype)            # (tn, D)
    sa = sa_ref[...].astype(compute_dtype)            # (tn, D)
    sb = sb_ref[...].astype(compute_dtype)            # (tn, D)

    coeff_cache = {}

    def coeffs(h):
        if h not in coeff_cache:
            if h == 1:
                coeff_cache[h] = (cf, sa, sb)
            else:
                coeff_cache[h] = (jnp.concatenate([cf] * h, axis=-1),
                                  jnp.concatenate([sa] * h, axis=-1),
                                  jnp.concatenate([sb] * h, axis=-1))
        return coeff_cache[h]

    def rot(x_ref, o_ref, h):
        c_t, sa_t, sb_t = coeffs(h)
        x = x_ref[...].astype(compute_dtype)           # (tn, h*D), lane-dense
        lanes = x.shape[-1]
        x_next = pltpu.roll(x, shift=lanes - shift, axis=1)   # x[..., j + shift]
        x_prev = pltpu.roll(x, shift=shift, axis=1)           # x[..., j - shift]
        o_ref[...] = (x * c_t + x_next * sa_t + x_prev * sb_t).astype(o_ref.dtype)

    rot(q_ref, q_out_ref, hq)
    rot(k_ref, k_out_ref, hk)


# ----------------------------------------------------------------------------
# Generation-aware configuration helpers
# ----------------------------------------------------------------------------
def _round_up(x, m):
    return ((x + m - 1) // m) * m


def _device_kind():
    try:
        return jax.devices()[0].device_kind.lower()
    except Exception:  # pragma: no cover
        return ""


def _vmem_capacity_bytes(kind):
    try:
        cap = int(pltpu.get_tpu_info().vmem_capacity_bytes)
        if cap > 0:
            return cap
    except Exception:
        pass
    # v7x has 64 MiB/TC; v5e/v6e have 128 MiB.
    return (64 << 20) if ("v7" in kind or "7x" in kind) else (128 << 20)


def _default_compute_dtype(in_dtype, kind):
    if jnp.dtype(in_dtype) == jnp.dtype(jnp.float32):
        return jnp.float32
    # bf16 VPU on v6e / v7x; v5e (and unknown chips) fall back to f32 compute.
    if ("v6" in kind) or ("v7" in kind) or ("7x" in kind):
        return jnp.bfloat16
    return jnp.float32


def _choose_row_tile(N, lanes_q, lanes_k, lanes_tbl, in_itemsize, compute_itemsize,
                     vmem_block_budget, min_grid_steps):
    """Largest token-row tile whose double-buffered blocks + compute temps fit the budget."""
    lq = _round_up(lanes_q, 128)
    lk = _round_up(lanes_k, 128)
    lt = _round_up(lanes_tbl, 128)
    per_row = (lq + lk) * in_itemsize * 2 * 2          # q/k in + out, double-buffered
    per_row += 3 * lt * in_itemsize * 2                # 3 coefficient tables, double-buffered
    per_row += (lq + lk + 3 * lt) * compute_itemsize * 4   # in-kernel temps headroom
    tn = int(vmem_block_budget // max(per_row, 1))
    tn = max(8, min(tn, 2048))
    tn -= tn % 8
    if min_grid_steps > 1:
        # Keep both TensorCores busy on v7x even for small-N (decode-style) calls.
        tn = min(tn, max(8, _round_up(-(-N // min_grid_steps), 8)))
    tn = min(tn, _round_up(N, 8))
    return max(tn, 8)


# ----------------------------------------------------------------------------
# Forward wrapper
# ----------------------------------------------------------------------------
@functools.partial(jax.jit,
                   static_argnames=("rotary_interleaved", "inplace", "compute_dtype",
                                    "tn", "vmem_block_budget"))
def gems_rope_forward(query, key, cos_cached, sin_cached, position_ids=None,
                      rotary_interleaved=False, inplace=False,
                      compute_dtype=None, tn=None, vmem_block_budget=None):
    """Apply RoPE to query/key using precomputed cos/sin caches.

    query: (B, S, Hq, D), key: (B, S, Hk, D); cos/sin_cached: (max_pos, D // 2)
    position_ids: optional (B, S) or (S,) int positions; defaults to arange(S).
    inplace=True aliases outputs onto the q/k input buffers (torch inplace semantics).
    Returns (query_rot, key_rot) with the same shapes/dtypes as the inputs.
    """
    B, S, Hq, D = query.shape
    _, _, Hk, _ = key.shape
    half = D // 2
    if cos_cached.shape[-1] * 2 != D:
        # TODO(synk): partial rotary (rotary_dim < head_dim) not supported.
        raise NotImplementedError("partial rotary (rotary_dim < head_dim) not supported")
    q_dtype, k_dtype = query.dtype, key.dtype

    kind = _device_kind()
    if compute_dtype is None:
        compute_dtype = _default_compute_dtype(q_dtype, kind)
    capacity = _vmem_capacity_bytes(kind)
    if vmem_block_budget is None:
        vmem_block_budget = min(32 << 20, capacity // 4)
    vmem_limit = min(int(capacity * 0.7), 100 << 20)

    if position_ids is None:
        pos = jnp.broadcast_to(jnp.arange(S, dtype=jnp.int32)[None, :], (B, S))
    else:
        pos = position_ids.astype(jnp.int32)
        if pos.ndim == 1:
            pos = jnp.broadcast_to(pos[None, :], (B, S))

    # Tiny per-position gather (tables are ~3/(Hq+Hk) of the q/k traffic).
    N = B * S
    cos = jnp.take(cos_cached, pos, axis=0).reshape(N, half)
    sin = jnp.take(sin_cached, pos, axis=0).reshape(N, half)
    zeros = jnp.zeros_like(sin)

    # (N, D) coefficient tables for the dual-roll formulation (built once in the
    # wrapper; no per-grid-step concat in the kernel).
    if rotary_interleaved:
        cf = jnp.stack([cos, cos], axis=-1).reshape(N, D)      # [c0,c0,c1,c1,...]
        sa = jnp.stack([-sin, zeros], axis=-1).reshape(N, D)   # [-s0,0,-s1,0,...]
        sb = jnp.stack([zeros, sin], axis=-1).reshape(N, D)    # [0,s0,0,s1,...]
        shift = 1
    else:
        cf = jnp.concatenate([cos, cos], axis=-1)              # [c, c]
        sa = jnp.concatenate([-sin, zeros], axis=-1)           # [-s, 0]
        sb = jnp.concatenate([zeros, sin], axis=-1)            # [0, s]
        shift = half

    # Lane-dense 2D layouts (free contiguous reshapes).
    lanes_q, lanes_k = Hq * D, Hk * D
    q2 = query.reshape(N, lanes_q)
    k2 = key.reshape(N, lanes_k)

    min_grid_steps = 2 if (("v7" in kind or "7x" in kind) and N >= 16) else 1
    if tn is None:
        tn = _choose_row_tile(N, lanes_q, lanes_k, D,
                              jnp.dtype(q_dtype).itemsize,
                              jnp.dtype(compute_dtype).itemsize,
                              vmem_block_budget, min_grid_steps)
    grid = (pl.cdiv(N, tn),)

    in_specs = [pl.BlockSpec((tn, lanes_q), lambda i: (i, 0)),
                pl.BlockSpec((tn, lanes_k), lambda i: (i, 0)),
                pl.BlockSpec((tn, D), lambda i: (i, 0)),
                pl.BlockSpec((tn, D), lambda i: (i, 0)),
                pl.BlockSpec((tn, D), lambda i: (i, 0))]
    out_specs = [pl.BlockSpec((tn, lanes_q), lambda i: (i, 0)),
                 pl.BlockSpec((tn, lanes_k), lambda i: (i, 0))]

    kernel = functools.partial(_rope_kernel, hq=Hq, hk=Hk, shift=shift,
                               compute_dtype=compute_dtype)

    q_out, k_out = pl.pallas_call(
        kernel,
        out_shape=(jax.ShapeDtypeStruct((N, lanes_q), q_dtype),
                   jax.ShapeDtypeStruct((N, lanes_k), k_dtype)),
        grid_spec=pltpu.PrefetchScalarGridSpec(
            num_scalar_prefetch=0,
            grid=grid,
            in_specs=in_specs,
            out_specs=out_specs),
        compiler_params=pltpu.CompilerParams(
            dimension_semantics=("parallel",),
            vmem_limit_bytes=vmem_limit),
        input_output_aliases=({0: 0, 1: 1} if inplace else {}),
    )(q2, k2, cf, sa, sb)

    return q_out.reshape(B, S, Hq, D), k_out.reshape(B, S, Hk, D)


# ----------------------------------------------------------------------------
# GemsRope "module": deterministic cos/sin cache construction.
# ----------------------------------------------------------------------------
class GemsRope:
    def __init__(self, rotary_dim, max_position_embeddings, base=10000.0,
                 rotary_interleaved=False, dtype=jnp.bfloat16):
        self.rotary_dim = rotary_dim
        self.max_position_embeddings = max_position_embeddings
        self.base = base
        self.rotary_interleaved = rotary_interleaved
        self.dtype = dtype
        self._set_cos_sin_cache()

    def _compute_inv_freq(self):
        return 1.0 / (self.base ** (
            jnp.arange(0, self.rotary_dim, 2, dtype=jnp.float32) / self.rotary_dim))

    def _set_cos_sin_cache(self):
        inv_freq = self._compute_inv_freq()                        # (D/2,)
        t = jnp.arange(self.max_position_embeddings, dtype=jnp.float32)
        freqs = jnp.outer(t, inv_freq)                             # (max_pos, D/2)
        self.cos_cached = jnp.cos(freqs).astype(self.dtype)
        self.sin_cached = jnp.sin(freqs).astype(self.dtype)

    def __call__(self, query, key, position_ids=None, inplace=False):
        return gems_rope_forward(query, key, self.cos_cached, self.sin_cached,
                                 position_ids=position_ids,
                                 rotary_interleaved=self.rotary_interleaved,
                                 inplace=inplace)


# ----------------------------------------------------------------------------
# Pure-JAX reference for correctness checks.
# ----------------------------------------------------------------------------
def _rope_ref(query, key, cos_cached, sin_cached, position_ids, interleaved):
    half = cos_cached.shape[-1]
    cos = jnp.take(cos_cached, position_ids, axis=0).astype(jnp.float32)[:, :, None, :]
    sin = jnp.take(sin_cached, position_ids, axis=0).astype(jnp.float32)[:, :, None, :]

    def rot(x):
        xf = x.astype(jnp.float32)
        if interleaved:
            x1, x2 = xf[..., 0::2], xf[..., 1::2]
            o1 = x1 * cos - x2 * sin
            o2 = x1 * sin + x2 * cos
            out = jnp.stack([o1, o2], axis=-1).reshape(x.shape)
        else:
            x1, x2 = xf[..., :half], xf[..., half:]
            out = jnp.concatenate([x1 * cos - x2 * sin, x1 * sin + x2 * cos], axis=-1)
        return out.astype(x.dtype)

    return rot(query), rot(key)


if __name__ == "__main__":
    rng = jax.random.PRNGKey(0)
    B, S, Hq, Hk, D = 2, 8, 4, 2, 64
    max_pos = 128

    k1, k2, k3 = jax.random.split(rng, 3)
    query = jax.random.normal(k1, (B, S, Hq, D), dtype=jnp.float32).astype(jnp.bfloat16)
    key_t = jax.random.normal(k2, (B, S, Hk, D), dtype=jnp.float32).astype(jnp.bfloat16)
    position_ids = jax.random.randint(k3, (B, S), 0, max_pos, dtype=jnp.int32)

    ATOL = RTOL = 2.5e-2   # bf16 caches + (possibly) bf16 compute on v6e/v7x

    # --- half-split (NeoX) mode via the module ---
    rope = GemsRope(rotary_dim=D, max_position_embeddings=max_pos,
                    base=10000.0, rotary_interleaved=False, dtype=jnp.bfloat16)
    q_out, k_out = rope(query, key_t, position_ids=position_ids)
    q_out = jax.block_until_ready(q_out)
    k_out = jax.block_until_ready(k_out)

    q_ref, k_ref = _rope_ref(query, key_t, rope.cos_cached, rope.sin_cached,
                             position_ids, interleaved=False)
    assert q_out.shape == query.shape and q_out.dtype == query.dtype
    assert k_out.shape == key_t.shape and k_out.dtype == key_t.dtype
    assert jnp.allclose(q_out.astype(jnp.float32), q_ref.astype(jnp.float32),
                        atol=ATOL, rtol=RTOL)
    assert jnp.allclose(k_out.astype(jnp.float32), k_ref.astype(jnp.float32),
                        atol=ATOL, rtol=RTOL)

    # --- interleaved (GPT-J) mode, exercising the inplace (aliased) path ---
    q_out_i, k_out_i = gems_rope_forward(query, key_t, rope.cos_cached, rope.sin_cached,
                                         position_ids=position_ids,
                                         rotary_interleaved=True, inplace=True)
    q_out_i = jax.block_until_ready(q_out_i)
    k_out_i = jax.block_until_ready(k_out_i)

    q_ref_i, k_ref_i = _rope_ref(query, key_t, rope.cos_cached, rope.sin_cached,
                                 position_ids, interleaved=True)
    assert jnp.allclose(q_out_i.astype(jnp.float32), q_ref_i.astype(jnp.float32),
                        atol=ATOL, rtol=RTOL)
    assert jnp.allclose(k_out_i.astype(jnp.float32), k_ref_i.astype(jnp.float32),
                        atol=ATOL, rtol=RTOL)

    print("KERNEL_OK")
</pallas_src>

<mosaic_0001>
module attributes {stable_mosaic.version = 11 : i64} {
  func.func @_rope_kernel(%arg0: i32, %arg1: memref<16x256xbf16, #tpu.memory_space<vmem>>, %arg2: memref<16x128xbf16, #tpu.memory_space<vmem>>, %arg3: memref<16x64xbf16, #tpu.memory_space<vmem>>, %arg4: memref<16x64xbf16, #tpu.memory_space<vmem>>, %arg5: memref<16x64xbf16, #tpu.memory_space<vmem>>, %arg6: memref<16x256xbf16, #tpu.memory_space<vmem>>, %arg7: memref<16x128xbf16, #tpu.memory_space<vmem>>) attributes {dimension_semantics = [#tpu.dimension_semantics<parallel>], iteration_bounds = array<i64: 1>, scalar_prefetch = 0 : i64, scratch_operands = 0 : i64, tpu.core_type = #tpu.core_type<tc>, window_params = [{transform_indices = @transform_0, window_bounds = array<i64: 16, 256>}, {transform_indices = @transform_1, window_bounds = array<i64: 16, 128>}, {transform_indices = @transform_2, window_bounds = array<i64: 16, 64>}, {transform_indices = @transform_3, window_bounds = array<i64: 16, 64>}, {transform_indices = @transform_4, window_bounds = array<i64: 16, 64>}, {transform_indices = @transform_5, window_bounds = array<i64: 16, 256>}, {transform_indices = @transform_6, window_bounds = array<i64: 16, 128>}]} {
    %c0 = arith.constant 0 : index
    %c0_0 = arith.constant 0 : index
    %0 = vector.load %arg3[%c0, %c0_0] : memref<16x64xbf16, #tpu.memory_space<vmem>>, vector<16x64xbf16>
    %1 = arith.extf %0 : vector<16x64xbf16> to vector<16x64xf32>
    %c0_1 = arith.constant 0 : index
    %c0_2 = arith.constant 0 : index
    %2 = vector.load %arg4[%c0_1, %c0_2] : memref<16x64xbf16, #tpu.memory_space<vmem>>, vector<16x64xbf16>
    %3 = arith.extf %2 : vector<16x64xbf16> to vector<16x64xf32>
    %c0_3 = arith.constant 0 : index
    %c0_4 = arith.constant 0 : index
    %4 = vector.load %arg5[%c0_3, %c0_4] : memref<16x64xbf16, #tpu.memory_space<vmem>>, vector<16x64xbf16>
    %5 = arith.extf %4 : vector<16x64xbf16> to vector<16x64xf32>
    %6 = tpu.concatenate %1, %1, %1, %1 in 1 : vector<16x64xf32>, vector<16x64xf32>, vector<16x64xf32>, vector<16x64xf32> -> vector<16x256xf32>
    %7 = tpu.concatenate %3, %3, %3, %3 in 1 : vector<16x64xf32>, vector<16x64xf32>, vector<16x64xf32>, vector<16x64xf32> -> vector<16x256xf32>
    %8 = tpu.concatenate %5, %5, %5, %5 in 1 : vector<16x64xf32>, vector<16x64xf32>, vector<16x64xf32>, vector<16x64xf32> -> vector<16x256xf32>
    %c0_5 = arith.constant 0 : index
    %c0_6 = arith.constant 0 : index
    %9 = vector.load %arg1[%c0_5, %c0_6] : memref<16x256xbf16, #tpu.memory_space<vmem>>, vector<16x256xbf16>
    %10 = arith.extf %9 : vector<16x256xbf16> to vector<16x256xf32>
    %c224_i32 = arith.constant 224 : i32
    %11 = tpu.dynamic_rotate %10 by %c224_i32 dim 1 : vector<16x256xf32>, i32 -> vector<16x256xf32>
    %c32_i32 = arith.constant 32 : i32
    %12 = tpu.dynamic_rotate %10 by %c32_i32 dim 1 : vector<16x256xf32>, i32 -> vector<16x256xf32>
    %13 = arith.mulf %10, %6 : vector<16x256xf32>
    %14 = arith.mulf %11, %7 : vector<16x256xf32>
    %15 = arith.addf %13, %14 : vector<16x256xf32>
    %16 = arith.mulf %12, %8 : vector<16x256xf32>
    %17 = arith.addf %15, %16 : vector<16x256xf32>
    %18 = arith.truncf %17 : vector<16x256xf32> to vector<16x256xbf16>
    %c0_7 = arith.constant 0 : index
    %c0_8 = arith.constant 0 : index
    %19 = vector.load %arg6[%c0_7, %c0_8] : memref<16x256xbf16, #tpu.memory_space<vmem>>, vector<16x256xbf16>
    tpu.vector_store %arg6[%c0_7, %c0_8], %18 {strides = array<i32>} : memref<16x256xbf16, #tpu.memory_space<vmem>>, vector<16x256xbf16>,
    %20 = tpu.concatenate %1, %1 in 1 : vector<16x64xf32>, vector<16x64xf32> -> vector<16x128xf32>
    %21 = tpu.concatenate %3, %3 in 1 : vector<16x64xf32>, vector<16x64xf32> -> vector<16x128xf32>
    %22 = tpu.concatenate %5, %5 in 1 : vector<16x64xf32>, vector<16x64xf32> -> vector<16x128xf32>
    %c0_9 = arith.constant 0 : index
    %c0_10 = arith.constant 0 : index
    %23 = vector.load %arg2[%c0_9, %c0_10] : memref<16x128xbf16, #tpu.memory_space<vmem>>, vector<16x128xbf16>
    %24 = arith.extf %23 : vector<16x128xbf16> to vector<16x128xf32>
    %c96_i32 = arith.constant 96 : i32
    %25 = tpu.dynamic_rotate %24 by %c96_i32 dim 1 : vector<16x128xf32>, i32 -> vector<16x128xf32>
    %c32_i32_11 = arith.constant 32 : i32
    %26 = tpu.dynamic_rotate %24 by %c32_i32_11 dim 1 : vector<16x128xf32>, i32 -> vector<16x128xf32>
    %27 = arith.mulf %24, %20 : vector<16x128xf32>
    %28 = arith.mulf %25, %21 : vector<16x128xf32>
    %29 = arith.addf %27, %28 : vector<16x128xf32>
    %30 = arith.mulf %26, %22 : vector<16x128xf32>
    %31 = arith.addf %29, %30 : vector<16x128xf32>
    %32 = arith.truncf %31 : vector<16x128xf32> to vector<16x128xbf16>
    %c0_12 = arith.constant 0 : index
    %c0_13 = arith.constant 0 : index
    %33 = vector.load %arg7[%c0_12, %c0_13] : memref<16x128xbf16, #tpu.memory_space<vmem>>, vector<16x128xbf16>
    tpu.vector_store %arg7[%c0_12, %c0_13], %32 {strides = array<i32>} : memref<16x128xbf16, #tpu.memory_space<vmem>>, vector<16x128xbf16>,
    return
  }
  func.func @transform_0(%arg0: i32) -> (i32, i32) {
    %c0_i32 = arith.constant 0 : i32
    %c0_i32_0 = arith.constant 0 : i32
    return %arg0, %c0_i32 : i32, i32
  }
  func.func @transform_1(%arg0: i32) -> (i32, i32) {
    %c0_i32 = arith.constant 0 : i32
    %c0_i32_0 = arith.constant 0 : i32
    return %arg0, %c0_i32 : i32, i32
  }
  func.func @transform_2(%arg0: i32) -> (i32, i32) {
    %c0_i32 = arith.constant 0 : i32
    %c0_i32_0 = arith.constant 0 : i32
    return %arg0, %c0_i32 : i32, i32
  }
  func.func @transform_3(%arg0: i32) -> (i32, i32) {
    %c0_i32 = arith.constant 0 : i32
    %c0_i32_0 = arith.constant 0 : i32
    return %arg0, %c0_i32 : i32, i32
  }
  func.func @transform_4(%arg0: i32) -> (i32, i32) {
    %c0_i32 = arith.constant 0 : i32
    %c0_i32_0 = arith.constant 0 : i32
    return %arg0, %c0_i32 : i32, i32
  }
  func.func @transform_5(%arg0: i32) -> (i32, i32) {
    %c0_i32 = arith.constant 0 : i32
    %c0_i32_0 = arith.constant 0 : i32
    return %arg0, %c0_i32 : i32, i32
  }
  func.func @transform_6(%arg0: i32) -> (i32, i32) {
    %c0_i32 = arith.constant 0 : i32
    %c0_i32_0 = arith.constant 0 : i32
    return %arg0, %c0_i32 : i32, i32
  }
}

</mosaic_0001>

<bundles_post_ra>
// kernel: gems_rope_forward.1
= control target key start
LH: loop header
LB: loop body
LE: loop exit
PB: predicated region body
PF: predicated region fallthrough
CT: control target
= control target key end

     0   :  { %12 = vsyncpa [#allocation3], 0  ;;  %s734_s0 = inlined_call_operand.hbm [shape: bf16[16,256], index: 0, kind: input, shape index: {}]   ;;  %s735_s1 = inlined_call_operand.hbm [shape: bf16[16,128], index: 1, kind: input, shape index: {}]   ;;  %s736_s2 = inlined_call_operand.hbm [shape: bf16[16,64], index: 2, kind: input, shape index: {}]   ;;  %s737_s3 = inlined_call_operand.hbm [shape: bf16[16,64], index: 3, kind: input, shape index: {}]   ;;  %s738_s4 = inlined_call_operand.hbm [shape: bf16[16,64], index: 4, kind: input, shape index: {}]   ;;  %s739_s5 = inlined_call_operand.hbm [shape: bf16[16,256], index: 5, kind: output, shape index: {0}]   ;;  %s740_s6 = inlined_call_operand.hbm [shape: bf16[16,128], index: 6, kind: output, shape index: {1}]  }
   0x1   :  { %13 = vsyncpa [#allocation6], 0 }
   0x2   :  { %14 = vsyncpa [#allocation9], 0 }
   0x3   :  { %15 = vsyncpa [#allocation4], 0 }
   0x4   :  { %16 = vsyncpa [#allocation13], 0  ;;  %s521_s21 = smov [#allocation5]   ;;  %s357_s25 = scalar_lea.hbm %s735_s1, 128 }
   0x5   :  { %s34_s22 = sshll.u32 %s521_s21, 4  ;;  %p358_p0 = scmp.ne.s32.totalorder %s735_s1, %s357_s25  ;;  %s35_s22 = int_to_ptr.vmem [resolvable:$true] %s34_s22 }
   0x6   :  { %p361_p1 = scmp.lt.u32.totalorder %s357_s25, %s735_s1 }
   0x8   :  { %p363_p2 = pnand %p361_p1, %p358_p0 }
   0xa   :  { %366 = shalt.err (!%p363_p2)
}
   0xb   :  { %s367_s30 = scalar_lea.vmem %s35_s22, 128  ;;  %p372_p4 = scmp.lt.s32.totalorder %s35_s22, %s35_s22 }
   0xc   :  { %p368_p3 = scmp.ne.s32.totalorder %s35_s22, %s367_s30  ;;  %p373_p5 = scmp.lt.s32.totalorder %s367_s30, %s367_s30 }
   0xe   :  { %p374_p6 = por %p373_p5, %p372_p4 }
  0x10   :  { %p375_p7 = pnand %p374_p6, %p368_p3 }
  0x12   :  { %378 = shalt.err (!%p375_p7)
}
  0x13   :  { %s522_s7 = smov 64   ;;  %s523_s8 = smov 4  }
  0x14   :  { %40 = dma.hbm_to_vmem [thread:$0]  %s735_s1, 128, %s35_s22, [#allocation6], %s522_s7, %s522_s7, %s523_s8  }
  0x15   :  { %s524_s11 = smov [#allocation8]   ;;  %s525_s13 = smov [#allocation2]  }
  0x16   :  { %s58_s12 = sshll.u32 %s524_s11, 4  ;;  %s22_s14 = sshll.u32 %s525_s13, 4  ;;  %s59_s12 = int_to_ptr.vmem [resolvable:$true] %s58_s12  ;;  %s23_s14 = int_to_ptr.vmem [resolvable:$true] %s22_s14 }
  0x17   :  { %s379_s17 = scalar_lea.hbm %s737_s3, 128 }
  0x18   :  { %p380_p8 = scmp.ne.s32.totalorder %s737_s3, %s379_s17  ;;  %p383_p9 = scmp.lt.u32.totalorder %s379_s17, %s737_s3 }
  0x1a   :  { %p385_p10 = pnand %p383_p9, %p380_p8 }
  0x1c   :  { %388 = shalt.err (!%p385_p10)
}
  0x1d   :  { %s389_s1 = scalar_lea.vmem %s59_s12, 128  ;;  %p394_p12 = scmp.lt.s32.totalorder %s59_s12, %s59_s12 }
  0x1e   :  { %p390_p11 = scmp.ne.s32.totalorder %s59_s12, %s389_s1  ;;  %p395_p13 = scmp.lt.s32.totalorder %s389_s1, %s389_s1 }
  0x20   :  { %p396_p0 = por %p395_p13, %p394_p12 }
  0x22   :  { %p397_p1 = pnand %p396_p0, %p390_p11 }
  0x24   :  { %400 = shalt.err (!%p397_p1)
}
  0x25   :  { %64 = dma.hbm_to_vmem [thread:$0]  %s737_s3, 128, %s59_s12, [#allocation9], %s522_s7, %s522_s7, %s523_s8  }
  0x26   :  { %s401_s26 = scalar_lea.hbm %s734_s0, 256 }
  0x27   :  { %p402_p2 = scmp.ne.s32.totalorder %s734_s0, %s401_s26  ;;  %p405_p3 = scmp.lt.u32.totalorder %s401_s26, %s734_s0 }
  0x29   :  { %p407_p4 = pnand %p405_p3, %p402_p2 }
  0x2b   :  { %410 = shalt.err (!%p407_p4)
}
  0x2c   :  { %s411_s9 = scalar_lea.vmem %s23_s14, 256  ;;  %p416_p6 = scmp.lt.s32.totalorder %s23_s14, %s23_s14 }
  0x2d   :  { %p412_p5 = scmp.ne.s32.totalorder %s23_s14, %s411_s9  ;;  %p417_p7 = scmp.lt.s32.totalorder %s411_s9, %s411_s9 }
  0x2f   :  { %p418_p8 = por %p417_p7, %p416_p6 }
  0x31   :  { %p419_p9 = pnand %p418_p8, %p412_p5 }
  0x33   :  { %422 = shalt.err (!%p419_p9)
}
  0x34   :  { %s526_s3 = smov 128   ;;  %s527_s10 = smov 8  }
  0x35   :  { %28 = dma.hbm_to_vmem [thread:$0]  %s734_s0, 256, %s23_s14, [#allocation3], %s526_s3, %s526_s3, %s527_s10  }
  0x36   :  { %s528_s13 = smov [#allocation7]   ;;  %s529_s16 = smov [#allocation10]  }
  0x37   :  { %s46_s15 = sshll.u32 %s528_s13, 4  ;;  %s70_s17 = sshll.u32 %s529_s16, 4  ;;  %s47_s15 = int_to_ptr.vmem [resolvable:$true] %s46_s15  ;;  %s71_s17 = int_to_ptr.vmem [resolvable:$true] %s70_s17 }
  0x38   :  { %s423_s20 = scalar_lea.hbm %s736_s2, 128 }
  0x39   :  { %p424_p10 = scmp.ne.s32.totalorder %s736_s2, %s423_s20  ;;  %p427_p11 = scmp.lt.u32.totalorder %s423_s20, %s736_s2 }
  0x3b   :  { %p429_p12 = pnand %p427_p11, %p424_p10 }
  0x3d   :  { %432 = shalt.err (!%p429_p12)
}
  0x3e   :  { %s433_s0 = scalar_lea.vmem %s47_s15, 128  ;;  %p438_p0 = scmp.lt.s32.totalorder %s47_s15, %s47_s15 }
  0x3f   :  { %p434_p13 = scmp.ne.s32.totalorder %s47_s15, %s433_s0  ;;  %p439_p1 = scmp.lt.s32.totalorder %s433_s0, %s433_s0 }
  0x41   :  { %p440_p2 = por %p439_p1, %p438_p0 }
  0x43   :  { %p441_p3 = pnand %p440_p2, %p434_p13 }
  0x45   :  { %444 = shalt.err (!%p441_p3)
}
  0x46   :  { %52 = dma.hbm_to_vmem [thread:$0]  %s736_s2, 128, %s47_s15, [#allocation6], %s522_s7, %s522_s7, %s523_s8  }
  0x47   :  { %s445_s27 = scalar_lea.hbm %s738_s4, 128 }
  0x48   :  { %p446_p4 = scmp.ne.s32.totalorder %s738_s4, %s445_s27  ;;  %p449_p5 = scmp.lt.u32.totalorder %s445_s27, %s738_s4 }
  0x4a   :  { %p451_p6 = pnand %p449_p5, %p446_p4 }
  0x4c   :  { %454 = shalt.err (!%p451_p6)
}
  0x4d   :  { %s455_s11 = scalar_lea.vmem %s71_s17, 128  ;;  %p460_p8 = scmp.lt.s32.totalorder %s71_s17, %s71_s17 }
  0x4e   :  { %p456_p7 = scmp.ne.s32.totalorder %s71_s17, %s455_s11  ;;  %p461_p9 = scmp.lt.s32.totalorder %s455_s11, %s455_s11 }
  0x50   :  { %p462_p10 = por %p461_p9, %p460_p8 }
  0x52   :  { %p463_p11 = pnand %p462_p10, %p456_p7 }
  0x54   :  { %466 = shalt.err (!%p463_p11)
}
  0x55   :  { %76 = dma.hbm_to_vmem [thread:$0]  %s738_s4, 128, %s71_s17, [#allocation9], %s522_s7, %s522_s7, %s523_s8  }
  0x56   :  { %511 = dma.done.wait [#allocation3], 256  }
  0x57   :  { %512 = vsyncadd [#allocation3], 4294967040 }
  0x58   :  { %513 = dma.done.wait [#allocation6], 256  }
  0x59   :  { %514 = vsyncadd [#allocation6], 4294967040 }
  0x5a   :  { %515 = dma.done.wait [#allocation9], 256  }
  0x5b   :  { %516 = vsyncadd [#allocation9], 4294967040  ;;  %v644_v0 = vld [vmem:[#allocation2] sm:$0xff]  ;;  %v646_v1 = vld [vmem:[#allocation2 + $0x8] sm:$0xff]  ;;  %s530_s4 = smov 96   ;;  %s531_s13 = smov 32   ;;  %v149_v24 = vlaneseq }
  0x5c   :  { %v279_v2 = vld [vmem:[#allocation7] sm:$0xff]   ;;  %v137_v3 = vunpack.c.l.bf16 %v644_v0  ;;  %v138_v4 = vunpack.c.h.bf16 %v644_v0  ;;  %v139_v5 = vunpack.c.l.bf16 %v646_v1  ;;  %v140_v6 = vunpack.c.h.bf16 %v646_v1  ;;  %v283_v7 = vld [vmem:[#allocation8] sm:$0xff]   ;;  %v652_v12 = vld [vmem:[#allocation10] sm:$0xff]   ;;  %s532_s15 = smov [#allocation11]   ;;  %s533_s17 = smov [#allocation12]  }
  0x5d   :  { %v280_v8 = vunpack.c.l.bf16 %v279_v2  ;;  %v281_v9 = vunpack.c.h.bf16 %v279_v2  ;;  %v284_v10 = vunpack.c.l.bf16 %v283_v7  ;;  %v285_v11 = vunpack.c.h.bf16 %v283_v7  ;;  %v658_v14 = vld [vmem:[#allocation5] sm:$0xff]   ;;  %s240_s16 = sshll.u32 %s532_s15, 4  ;;  %s252_s18 = sshll.u32 %s533_s17, 4  ;;  %s241_s16 = int_to_ptr.vmem [resolvable:$true] %s240_s16  ;;  %s697_s18 = int_to_ptr.vmem [resolvable:$true] %s252_s18 }
  0x5e   :  { %v322_v13 = vpack.i.bf16 %v139_v5, %v137_v3  ;;  %v327_v16 = vpack.i.bf16 %v140_v6, %v138_v4  ;;  %v288_v17 = vunpack.c.l.bf16 %v652_v12  ;;  %v289_v18 = vunpack.c.h.bf16 %v652_v12  ;;  %s467_s19 = scalar_lea.vmem %s241_s16, 256  ;;  %p472_p13 = scmp.lt.s32.totalorder %s241_s16, %s241_s16 }
  0x5f   :  { %v312_v15 = vpack.i.bf16 %v281_v9, %v280_v8  ;;  %v317_v19 = vpack.i.bf16 %v285_v11, %v284_v10  ;;  %v292_v20 = vunpack.c.l.bf16 %v658_v14  ;;  %v293_v21 = vunpack.c.h.bf16 %v658_v14  ;;  %p468_p12 = scmp.ne.s32.totalorder %s241_s16, %s467_s19  ;;  %p473_p0 = scmp.lt.s32.totalorder %s467_s19, %s467_s19 }
  0x60   :  { %323 = vrot.lane.b32.xlu1 %v322_v13, %s530_s4  ;;  %v337_v22 = vpack.i.bf16 %v289_v18, %v288_v17  ;;  %v150_v27 = vand.u32 127, %v149_v24  ;;  %vm112_vm0 = vcmask 523264  }
  0x61   :  { %313 = vrot.lane.b32.xlu0 %v312_v15, %s522_s7  ;;  %v332_v23 = vpack.i.bf16 %v293_v21, %v292_v20  ;;  %p474_p1 = por %p473_p0, %p472_p13 }
  0x62   :  { %vm151_vm1 = vcmp.lt.s32.totalorder %v150_v27, 96  ;;  %vm164_vm2 = vcmp.lt.s32.totalorder %v150_v27, 32 }
  0x63   :  { %p475_p2 = pnand %p474_p1, %p468_p12 }
  0x64   :  { %328 = vrot.lane.b32.xlu1 %v327_v16, %s530_s4 }
  0x65   :  { %318 = vrot.lane.b32.xlu0 %v317_v19, %s522_s7 }
  0x68   :  { %338 = vrot.lane.b32.xlu1 %v337_v22, %s522_s7 }
  0x69   :  { %333 = vrot.lane.b32.xlu0 %v332_v23, %s530_s4 }
  0x6c   :  { %348 = vrot.lane.b32.xlu1 %v327_v16, %s531_s13 }
  0x6d   :  { %343 = vrot.lane.b32.xlu0 %v322_v13, %s531_s13 }
  0x71   :  { %353 = vrot.lane.b32.xlu0 %v332_v23, %s531_s13 }
  0xd2   :  { %v324_v25 = vpop.permute.xlu1 %323 }
  0xd3   :  { %v314_v26 = vpop.permute.xlu0 %313  ;;  %v326_v30 = vunpack.i.h.bf16 %v324_v25  ;;  %v325_v31 = vunpack.i.l.bf16 %v324_v25 }
  0xd4   :  { %v316_v28 = vunpack.i.h.bf16 %v314_v26  ;;  %v315_v29 = vunpack.i.l.bf16 %v314_v26 }
  0xd6   :  { %v329_v32 = vpop.permute.xlu1 %328  ;;  %v114_v38 = vsel %vm112_vm0, %v281_v9, %v316_v28  ;;  %v113_v39 = vsel %vm112_vm0, %v280_v8, %v315_v29 }
  0xd7   :  { %v319_v33 = vpop.permute.xlu0 %318  ;;  %v331_v34 = vunpack.i.h.bf16 %v329_v32  ;;  %v330_v35 = vunpack.i.l.bf16 %v329_v32  ;;  %v171_v56 = vmul.f32 %v139_v5, %v114_v38  ;;  %v172_v57 = vmul.f32 %v140_v6, %v114_v38 }
  0xd8   :  { %v321_v36 = vunpack.i.h.bf16 %v319_v33  ;;  %v320_v37 = vunpack.i.l.bf16 %v319_v33  ;;  %v169_v58 = vmul.f32 %v137_v3, %v113_v39  ;;  %v170_v59 = vmul.f32 %v138_v4, %v113_v39 }
  0xd9   :  { %v152_v40 = vsel %vm151_vm1, %v325_v31, %v330_v35  ;;  %v153_v41 = vsel %vm151_vm1, %v326_v30, %v331_v34  ;;  %v154_v42 = vsel %vm151_vm1, %v330_v35, %v325_v31  ;;  %v155_v43 = vsel %vm151_vm1, %v331_v34, %v326_v30 }
  0xda   :  { %v339_v44 = vpop.permute.xlu1 %338  ;;  %v123_v48 = vsel %vm112_vm0, %v284_v10, %v320_v37  ;;  %v124_v49 = vsel %vm112_vm0, %v285_v11, %v321_v36  ;;  %v215_v22 = vmul.f32 %v292_v20, %v113_v39  ;;  %v216_v23 = vmul.f32 %v293_v21, %v114_v38 }
  0xdb   :  { %v341_v45 = vunpack.i.h.bf16 %v339_v44  ;;  %v340_v46 = vunpack.i.l.bf16 %v339_v44  ;;  %v334_v47 = vpop.permute.xlu0 %333  ;;  %v173_v52 = vmul.f32 %v152_v40, %v123_v48  ;;  %v174_v53 = vmul.f32 %v154_v42, %v123_v48 }
  0xdc   :  { %v336_v50 = vunpack.i.h.bf16 %v334_v47  ;;  %v335_v51 = vunpack.i.l.bf16 %v334_v47  ;;  %v175_v54 = vmul.f32 %v153_v41, %v124_v49  ;;  %v176_v55 = vmul.f32 %v155_v43, %v124_v49 }
  0xdd   :  { %v133_v2 = vsel %vm112_vm0, %v288_v17, %v340_v46  ;;  %v134_v7 = vsel %vm112_vm0, %v289_v18, %v341_v45  ;;  %v177_v1 = vadd.f32 %v173_v52, %v169_v58  ;;  %v178_v6 = vadd.f32 %v174_v53, %v170_v59 }
  0xde   :  { %v349_v60 = vpop.permute.xlu1 %348  ;;  %v217_v8 = vmul.f32 %v335_v51, %v123_v48  ;;  %v218_v9 = vmul.f32 %v336_v50, %v124_v49  ;;  %v179_v11 = vadd.f32 %v175_v54, %v171_v56  ;;  %v180_v12 = vadd.f32 %v176_v55, %v172_v57 }
  0xdf   :  { %v351_v61 = vunpack.i.h.bf16 %v349_v60  ;;  %v350_v62 = vunpack.i.l.bf16 %v349_v60  ;;  %v344_v63 = vpop.permute.xlu0 %343 }
  0xe0   :  { %v346_v5 = vunpack.i.h.bf16 %v344_v63  ;;  %v345_v10 = vunpack.i.l.bf16 %v344_v63  ;;  %v219_v30 = vadd.f32 %v217_v8, %v215_v22  ;;  %v220_v31 = vadd.f32 %v218_v9, %v216_v23 }
  0xe2   :  { %v166_v3 = vsel %vm164_vm2, %v346_v5, %v351_v61  ;;  %v168_v0 = vsel %vm164_vm2, %v351_v61, %v346_v5  ;;  %v165_v4 = vsel %vm164_vm2, %v345_v10, %v350_v62  ;;  %v167_v13 = vsel %vm164_vm2, %v350_v62, %v345_v10 }
  0xe3   :  { %v354_v15 = vpop.permute.xlu0 %353  ;;  %v181_v16 = vmul.f32 %v167_v13, %v133_v2  ;;  %v182_v17 = vmul.f32 %v165_v4, %v133_v2  ;;  %v183_v18 = vmul.f32 %v168_v0, %v134_v7  ;;  %v184_v19 = vmul.f32 %v166_v3, %v134_v7 }
  0xe4   :  { %v356_v24 = vunpack.i.h.bf16 %v354_v15  ;;  %v355_v25 = vunpack.i.l.bf16 %v354_v15 }
  0xe5   :  { %v185_v26 = vadd.f32 %v181_v16, %v177_v1  ;;  %v186_v28 = vadd.f32 %v182_v17, %v178_v6  ;;  %v187_v29 = vadd.f32 %v183_v18, %v179_v11  ;;  %v188_v27 = vadd.f32 %v184_v19, %v180_v12 }
  0xe6   :  { %v222_v32 = vmul.f32 %v356_v24, %v134_v7  ;;  %v221_v33 = vmul.f32 %v355_v25, %v133_v2 }
  0xe7   :  { %v274_v34 = vpack.c.bf16 %v186_v28, %v185_v26  ;;  %v275_v35 = vpack.c.bf16 %v188_v27, %v187_v29 }
  0xe8   :  { %v223_v20 = vadd.f32 %v221_v33, %v219_v30  ;;  %v224_v14 = vadd.f32 %v222_v32, %v220_v31 }
  0xe9   :  { %201 = vst [vmem:[#allocation11] sm:$0xff] %v274_v34  ;;  %202 = vst [vmem:[#allocation11 + $0x8] sm:$0xff] %v275_v35 }
  0xea   :  { %478 = shalt.err (!%p475_p2)
}
  0xeb   :  { %s479_s1 = scalar_lea.hbm %s739_s5, 256 }
  0xec   :  { %p480_p3 = scmp.ne.s32.totalorder %s739_s5, %s479_s1  ;;  %p483_p4 = scmp.lt.u32.totalorder %s479_s1, %s739_s5 }
  0xee   :  { %p485_p5 = pnand %p483_p4, %p480_p3 }
  0xf0   :  { %488 = shalt.err (!%p485_p5)
}
  0xf1   :  { %246 = dma.vmem_to_hbm [thread:$0]  %s241_s16, 256, %s739_s5, [#allocation4], %s526_s3, %s526_s3, %s527_s10   ;;  %v297_v21 = vpack.c.bf16 %v224_v14, %v223_v20 }
  0xf2   :  { %s489_s26 = scalar_lea.vmem %s697_s18, 128  ;;  %p494_p7 = scmp.lt.s32.totalorder %s697_s18, %s697_s18 }
  0xf3   :  { %298 = vst [vmem:[#allocation12] sm:$0xff] %v297_v21   ;;  %p490_p6 = scmp.ne.s32.totalorder %s697_s18, %s489_s26  ;;  %p495_p8 = scmp.lt.s32.totalorder %s489_s26, %s489_s26 }
  0xf5   :  { %p496_p9 = por %p495_p8, %p494_p7 }
  0xf7   :  { %p497_p10 = pnand %p496_p9, %p490_p6 }
  0xf9   :  { %500 = shalt.err (!%p497_p10)
}
  0xfa   :  { %s501_s29 = scalar_lea.hbm %s740_s6, 128 }
  0xfb   :  { %p502_p11 = scmp.ne.s32.totalorder %s740_s6, %s501_s29  ;;  %p505_p12 = scmp.lt.u32.totalorder %s501_s29, %s740_s6 }
  0xfd   :  { %p507_p13 = pnand %p505_p12, %p502_p11 }
  0xff   :  { %510 = shalt.err (!%p507_p13)
}
 0x100   :  { %258 = dma.vmem_to_hbm [thread:$0]  %s697_s18, 128, %s740_s6, [#allocation13], %s522_s7, %s522_s7, %s523_s8  }
 0x101   :  { %517 = dma.done.wait [#allocation4], 256  }
 0x102   :  { %518 = vsyncadd [#allocation4], 4294967040 }
 0x103   :  { %519 = dma.done.wait [#allocation13], 128  }
 0x104   :  { %520 = vsyncadd [#allocation13], 4294967168 }
 0x105   :  { %265 = vsyncpa [#allocation3], 1 }
 0x106   :  { %266 = vsyncpa [#allocation6], 1 }
 0x107   :  { %267 = vsyncpa [#allocation9], 1 }
 0x108   :  { %268 = vsyncpa [#allocation4], 1 }
 0x109   :  { %269 = vsyncpa [#allocation13], 1 }

</bundles_post_ra>
